<compile_context>
chip_gen: v7x
topology: tpu7x:2x2x1
jax: 0.10.0
libtpu: 0.0.40
codegen_flags: <defaults>
</compile_context>

<pallas_src>
import jax
import jax.numpy as jnp
from jax.experimental import pallas as pl
from jax.experimental.pallas import tpu as pltpu

HIDDEN = 768  # 6 * 128 -> lane-aligned


def _round_up(x, m):
    return (x + m - 1) // m * m


def _sampling_policy_kernel(x_ref, w_ref, b_ref, o_ref):
    # x_ref: [TB, 768] VMEM   w_ref: [1, 768] VMEM (resident)
    # b_ref: [1, 1]   SMEM    o_ref: [1, TB]  VMEM (lane-dense)
    x = x_ref[...]
    w = w_ref[...]                                   # broadcasts over sublanes
    logits = jnp.sum(x * w, axis=1)                  # VPU mul + lane reduce -> (TB,)
    logits = logits + b_ref[0, 0]                    # scalar bias from SMEM
    out = jax.nn.sigmoid(logits) * 2.0               # EUP transcendental
    o_ref[...] = out.reshape(1, -1).astype(o_ref.dtype)


def sampling_policy(prompt_embedding, weight, bias, *, tile_b=512):
    """prompt_embedding: [B, 768]; weight: [1, 768]; bias: [1] (PyTorch conv.)."""
    B, H = prompt_embedding.shape
    assert H == HIDDEN

    x = prompt_embedding.astype(jnp.float32)
    w = weight.reshape(1, HIDDEN).astype(jnp.float32)       # no transpose needed
    b = bias.reshape(1, 1).astype(jnp.float32)               # SMEM scalar

    # Batch tile: multiple of 128 (lane-dense output), capped at tile_b rows.
    TB = min(tile_b, _round_up(B, 128))
    B_pad = _round_up(B, TB)
    if B_pad != B:
        x = jnp.pad(x, ((0, B_pad - B), (0, 0)))
    num_tiles = B_pad // TB

    out = pl.pallas_call(
        _sampling_policy_kernel,
        out_shape=jax.ShapeDtypeStruct((1, B_pad), jnp.float32),
        grid=(num_tiles,),
        in_specs=[
            pl.BlockSpec((TB, HIDDEN), lambda i: (i, 0)),               # x tile
            pl.BlockSpec((1, HIDDEN), lambda i: (0, 0)),                # weight (resident)
            pl.BlockSpec(memory_space=pltpu.MemorySpace.SMEM),          # bias scalar
        ],
        out_specs=pl.BlockSpec((1, TB), lambda i: (0, i)),              # lane-dense
        compiler_params=pltpu.CompilerParams(
            dimension_semantics=("parallel",),
        ),
    )(x, w, b)

    # Back to the PyTorch layout [B, 1].
    return out[0, :B].reshape(B, 1)


if __name__ == "__main__":
    key = jax.random.PRNGKey(0)
    k_x, k_w, k_b = jax.random.split(key, 3)

    B = 8
    x = jax.random.normal(k_x, (B, HIDDEN), dtype=jnp.float32)

    # Deterministic init mimicking nn.Linear(768, 1): U(-1/sqrt(768), 1/sqrt(768))
    bound = 1.0 / jnp.sqrt(jnp.float32(HIDDEN))
    weight = jax.random.uniform(k_w, (1, HIDDEN), minval=-bound, maxval=bound,
                                dtype=jnp.float32)
    bias = jax.random.uniform(k_b, (1,), minval=-bound, maxval=bound,
                              dtype=jnp.float32)

    out = sampling_policy(x, weight, bias)
    jax.block_until_ready(out)

    # Reference check in plain JAX.
    ref = jax.nn.sigmoid(x @ weight.T + bias) * 2.0
    assert out.shape == (B, 1)
    assert jnp.allclose(out, ref, atol=1e-5, rtol=1e-5)

    print("KERNEL_OK")
</pallas_src>

<mosaic_0001>
module attributes {stable_mosaic.version = 11 : i64} {
  func.func @_sampling_policy_kernel(%arg0: i32, %arg1: memref<128x768xf32, #tpu.memory_space<vmem>>, %arg2: memref<1x768xf32, #tpu.memory_space<vmem>>, %arg3: memref<1x1xf32, #tpu.memory_space<smem>>, %arg4: memref<1x128xf32, #tpu.memory_space<vmem>>) attributes {dimension_semantics = [#tpu.dimension_semantics<parallel>], iteration_bounds = array<i64: 1>, scalar_prefetch = 0 : i64, scratch_operands = 0 : i64, tpu.core_type = #tpu.core_type<tc>, window_params = [{transform_indices = @transform_0, window_bounds = array<i64: 128, 768>}, {pipeline_mode = #tpu.pipeline_mode<synchronous>, transform_indices = @transform_1, window_bounds = array<i64: 1, 768>}, {transform_indices = @transform_2, window_bounds = array<i64: 1, 1>}, {transform_indices = @transform_3, window_bounds = array<i64: 1, 128>}]} {
    %c0 = arith.constant 0 : index
    %c0_0 = arith.constant 0 : index
    %0 = vector.load %arg1[%c0, %c0_0] : memref<128x768xf32, #tpu.memory_space<vmem>>, vector<128x768xf32>
    %c0_1 = arith.constant 0 : index
    %c0_2 = arith.constant 0 : index
    %1 = vector.load %arg2[%c0_1, %c0_2] : memref<1x768xf32, #tpu.memory_space<vmem>>, vector<1x768xf32>
    %2 = vector.broadcast %1 : vector<1x768xf32> to vector<128x768xf32>
    %3 = arith.mulf %0, %2 : vector<128x768xf32>
    %cst = arith.constant dense<0.000000e+00> : vector<128xf32>
    %4 = vector.multi_reduction <add>, %3, %cst [1] : vector<128x768xf32> to vector<128xf32>
    %c0_3 = arith.constant 0 : index
    %c0_4 = arith.constant 0 : index
    %5 = memref.load %arg3[%c0_3, %c0_4] : memref<1x1xf32, #tpu.memory_space<smem>>
    %6 = vector.broadcast %5 : f32 to vector<128xf32>
    %7 = arith.addf %4, %6 : vector<128xf32>
    %8 = arith.negf %7 : vector<128xf32>
    %9 = math.exp %8 : vector<128xf32>
    %cst_5 = arith.constant 1.000000e+00 : f32
    %10 = vector.broadcast %cst_5 : f32 to vector<128xf32>
    %11 = arith.addf %10, %9 : vector<128xf32>
    %12 = arith.divf %10, %11 : vector<128xf32>
    %cst_6 = arith.constant 2.000000e+00 : f32
    %13 = vector.broadcast %cst_6 : f32 to vector<128xf32>
    %14 = arith.mulf %12, %13 : vector<128xf32>
    %15 = vector.shape_cast %14 : vector<128xf32> to vector<1x128xf32>
    %c0_7 = arith.constant 0 : index
    %c0_8 = arith.constant 0 : index
    %16 = vector.load %arg4[%c0_7, %c0_8] : memref<1x128xf32, #tpu.memory_space<vmem>>, vector<1x128xf32>
    tpu.vector_store %arg4[%c0_7, %c0_8], %15 {strides = array<i32>} : memref<1x128xf32, #tpu.memory_space<vmem>>, vector<1x128xf32>,
    return
  }
  func.func @transform_0(%arg0: i32) -> (i32, i32) {
    %c0_i32 = arith.constant 0 : i32
    %c0_i32_0 = arith.constant 0 : i32
    return %arg0, %c0_i32 : i32, i32
  }
  func.func @transform_1(%arg0: i32) -> (i32, i32) {
    %c0_i32 = arith.constant 0 : i32
    %c0_i32_0 = arith.constant 0 : i32
    %c0_i32_1 = arith.constant 0 : i32
    return %c0_i32, %c0_i32_0 : i32, i32
  }
  func.func @transform_2(%arg0: i32) -> (i32, i32) {
    %c0_i32 = arith.constant 0 : i32
    %c0_i32_0 = arith.constant 0 : i32
    %c0_i32_1 = arith.constant 0 : i32
    return %c0_i32, %c0_i32_0 : i32, i32
  }
  func.func @transform_3(%arg0: i32) -> (i32, i32) {
    %c0_i32 = arith.constant 0 : i32
    %c0_i32_0 = arith.constant 0 : i32
    return %c0_i32, %arg0 : i32, i32
  }
}

</mosaic_0001>

<bundles_post_ra>
// kernel: tpu_custom_call.1
= control target key start
LH: loop header
LB: loop body
LE: loop exit
PB: predicated region body
PF: predicated region fallthrough
CT: control target
= control target key end

     0   :  { %9 = vsyncpa [#allocation4], 0  ;;  %s999_s0 = inlined_call_operand.hbm [shape: f32[128,768], index: 0, kind: input, shape index: {}]   ;;  %s1000_s1 = inlined_call_operand.vmem [shape: f32[1,768], index: 1, kind: input, shape index: {}]   ;;  %s1001_s2 = inlined_call_operand.<no memory space> [shape: f32[1,1], index: 2, kind: input, shape index: {}]   ;;  %s1002_s3 = inlined_call_operand.hbm [shape: f32[1,128], index: 3, kind: output, shape index: {}]  }
   0x1   :  { %10 = vsyncpa [#allocation5], 0  ;;  %s772_s12 = smov [#allocation3]   ;;  %s724_s16 = scalar_lea.hbm %s999_s0, 12288 }
   0x2   :  { %s16_s13 = sshll.u32 %s772_s12, 4  ;;  %p725_p0 = scmp.ne.s32.totalorder %s999_s0, %s724_s16  ;;  %s17_s13 = int_to_ptr.vmem [resolvable:$true] %s16_s13 }
   0x3   :  { %p728_p1 = scmp.lt.u32.totalorder %s724_s16, %s999_s0 }
   0x5   :  { %p730_p2 = pnand %p728_p1, %p725_p0 }
   0x7   :  { %733 = shalt.err (!%p730_p2)
}
   0x8   :  { %s734_s21 = scalar_lea.vmem %s17_s13, 12288  ;;  %p739_p4 = scmp.lt.s32.totalorder %s17_s13, %s17_s13 }
   0x9   :  { %p735_p3 = scmp.ne.s32.totalorder %s17_s13, %s734_s21  ;;  %p740_p5 = scmp.lt.s32.totalorder %s734_s21, %s734_s21 }
   0xb   :  { %p741_p6 = por %p740_p5, %p739_p4 }
   0xd   :  { %p742_p7 = pnand %p741_p6, %p735_p3 }
   0xf   :  { %745 = shalt.err (!%p742_p7)
}
  0x10   :  { %s773_s22 = smov 768   ;;  %s774_s23 = smov 48  }
  0x11   :  { %22 = dma.hbm_to_vmem [thread:$0]  %s999_s0, 12288, %s17_s13, [#allocation4], %s773_s22, %s773_s22, %s774_s23  }
  0x12   :  { %768 = dma.done.wait [#allocation4], 12288  }
  0x13   :  { %769 = vsyncadd [#allocation4], 4294955008  ;;  %v128_v0 = vlaneseq  ;;  %v30_v8 = vld [vmem:[#allocation3] sm:$0xff]  ;;  %v31_v9 = vld [vmem:[#allocation3 + $0x8] sm:$0xff]  ;;  %vm523_vm0 = vcmask 130112   ;;  %vm530_vm1 = vcmask 195712  }
  0x14   :  { %v32_v10 = vld [vmem:[#allocation3 + $0x10] sm:$0xff]  ;;  %v126_v11 = vld [vmem:[%s1000_s1] sm:$0x3f]  ;;  %v33_v12 = vld [vmem:[#allocation3 + $0x18] sm:$0xff]  ;;  %vm537_vm2 = vcmask 261312   ;;  %vm544_vm3 = vcmask 326912  }
  0x15   :  { %v809_v1 = vshrl.u32 %v128_v0, 7  ;;  %v42_v17 = vld [vmem:[#allocation3 + $0x60] sm:$0xff]  ;;  %v43_v18 = vld [vmem:[#allocation3 + $0x68] sm:$0xff]  ;;  %v44_v23 = vld [vmem:[#allocation3 + $0x70] sm:$0xff]  ;;  %vm551_vm4 = vcmask 392512   ;;  %vm558_vm5 = vcmask 458112  }
  0x16   :  { %v34_v19 = vld [vmem:[#allocation3 + $0x20] sm:$0xff]  ;;  %v35_v20 = vld [vmem:[#allocation3 + $0x28] sm:$0xff]  ;;  %v45_v27 = vld [vmem:[#allocation3 + $0x78] sm:$0xff]  ;;  %vm565_vm6 = vcmask 523712   ;;  %vm572_vm7 = vcmask 589312   ;;  %vm579_vm8 = vcmask 654912  }
  0x17   :  { %v130_v2 = vsub.s32 0, %v809_v1  ;;  %v134_v3 = vsub.s32 1, %v809_v1  ;;  %v138_v4 = vsub.s32 2, %v809_v1  ;;  %v142_v5 = vsub.s32 3, %v809_v1  ;;  %v36_v28 = vld [vmem:[#allocation3 + $0x30] sm:$0xff]  ;;  %v37_v29 = vld [vmem:[#allocation3 + $0x38] sm:$0xff] }
  0x18   :  { %v146_v6 = vsub.s32 4, %v809_v1  ;;  %v150_v7 = vsub.s32 5, %v809_v1  ;;  %v46_v31 = vld [vmem:[#allocation3 + $0x80] sm:$0xff]  ;;  %v47_v32 = vld [vmem:[#allocation3 + $0x88] sm:$0xff]  ;;  %v48_v41 = vld [vmem:[#allocation3 + $0x90] sm:$0xff]  ;;  %vm586_vm9 = vcmask 720512  }
  0x19   :  { %v820_v13 = vrot.slane %v126_v11, %v130_v2  ;;  %v822_v14 = vrot.slane %v126_v11, %v134_v3  ;;  %v824_v15 = vrot.slane %v126_v11, %v138_v4  ;;  %v826_v16 = vrot.slane %v126_v11, %v142_v5  ;;  %v38_v35 = vld [vmem:[#allocation3 + $0x40] sm:$0xff]  ;;  %v39_v40 = vld [vmem:[#allocation3 + $0x48] sm:$0xff]  ;;  %v40_v44 = vld [vmem:[#allocation3 + $0x50] sm:$0xff] }
  0x1a   :  { %v828_v21 = vrot.slane %v126_v11, %v146_v6  ;;  %v830_v22 = vrot.slane %v126_v11, %v150_v7  ;;  %v49_v47 = vld [vmem:[#allocation3 + $0x98] sm:$0xff]  ;;  %v50_v48 = vld [vmem:[#allocation3 + $0xa0] sm:$0xff]  ;;  %v51_v54 = vld [vmem:[#allocation3 + $0xa8] sm:$0xff]  ;;  %vm593_vm10 = vcmask 786112   ;;  %vm600_vm11 = vcmask 851712  }
  0x1b   :  { %v158_v24 = vmul.f32 %v820_v13, %v30_v8  ;;  %v159_v25 = vmul.f32 %v822_v14, %v31_v9  ;;  %v160_v26 = vmul.f32 %v824_v15, %v32_v10  ;;  %v161_v30 = vmul.f32 %v826_v16, %v33_v12  ;;  %v41_v52 = vld [vmem:[#allocation3 + $0x58] sm:$0xff]  ;;  %v54_v59 = vld [vmem:[#allocation3 + $0xc0] sm:$0xff]  ;;  %v55_v60 = vld [vmem:[#allocation3 + $0xc8] sm:$0xff] }
  0x1c   :  { %v170_v33 = vmul.f32 %v820_v13, %v42_v17  ;;  %v171_v34 = vmul.f32 %v822_v14, %v43_v18  ;;  %v162_v36 = vmul.f32 %v828_v21, %v34_v19  ;;  %v163_v37 = vmul.f32 %v830_v22, %v35_v20  ;;  %v52_v63 = vld [vmem:[#allocation3 + $0xb0] sm:$0xff]  ;;  %v53_v8 = vld [vmem:[#allocation3 + $0xb8] sm:$0xff] }
  0x1d   :  { %v254_v38 = vadd.f32 %v159_v25, %v158_v24  ;;  %v172_v39 = vmul.f32 %v824_v15, %v44_v23  ;;  %v173_v42 = vmul.f32 %v826_v16, %v45_v27  ;;  %v164_v45 = vmul.f32 %v820_v13, %v36_v28  ;;  %v56_v4 = vld [vmem:[#allocation3 + $0xd0] sm:$0xff]  ;;  %v57_v10 = vld [vmem:[#allocation3 + $0xd8] sm:$0xff]  ;;  %v58_v25 = vld [vmem:[#allocation3 + $0xe0] sm:$0xff] }
  0x1e   :  { %v268_v43 = vadd.f32 %v171_v34, %v170_v33  ;;  %v165_v46 = vmul.f32 %v822_v14, %v37_v29  ;;  %v174_v50 = vmul.f32 %v828_v21, %v46_v31  ;;  %v175_v51 = vmul.f32 %v830_v22, %v47_v32  ;;  %v60_v19 = vld [vmem:[#allocation3 + $0xf0] sm:$0xff]  ;;  %v61_v27 = vld [vmem:[#allocation3 + $0xf8] sm:$0xff]  ;;  %v62_v28 = vld [vmem:[#allocation3 + $0x100] sm:$0xff] }
  0x1f   :  { %v255_v49 = vadd.f32 %v254_v38, %v160_v26  ;;  %v166_v53 = vmul.f32 %v824_v15, %v38_v35  ;;  %v167_v56 = vmul.f32 %v826_v16, %v39_v40  ;;  %v176_v58 = vmul.f32 %v820_v13, %v48_v41  ;;  %v59_v32 = vld [vmem:[#allocation3 + $0xe8] sm:$0xff]  ;;  %v66_v40 = vld [vmem:[#allocation3 + $0x120] sm:$0xff] }
  0x20   :  { %v269_v55 = vadd.f32 %v268_v43, %v172_v39  ;;  %v261_v57 = vadd.f32 %v165_v46, %v164_v45  ;;  %v168_v62 = vmul.f32 %v828_v21, %v40_v44  ;;  %v177_v2 = vmul.f32 %v822_v14, %v49_v47  ;;  %v63_v34 = vld [vmem:[#allocation3 + $0x108] sm:$0xff]  ;;  %v64_v44 = vld [vmem:[#allocation3 + $0x110] sm:$0xff] }
  0x21   :  { %v256_v61 = vadd.f32 %v255_v49, %v161_v30  ;;  %v178_v3 = vmul.f32 %v824_v15, %v50_v48  ;;  %v169_v6 = vmul.f32 %v830_v22, %v41_v52  ;;  %v179_v9 = vmul.f32 %v826_v16, %v51_v54  ;;  %v67_v41 = vld [vmem:[#allocation3 + $0x128] sm:$0xff]  ;;  %v68_v47 = vld [vmem:[#allocation3 + $0x130] sm:$0xff]  ;;  %v69_v52 = vld [vmem:[#allocation3 + $0x138] sm:$0xff] }
  0x22   :  { %v270_v5 = vadd.f32 %v269_v55, %v173_v42  ;;  %v262_v7 = vadd.f32 %v261_v57, %v166_v53  ;;  %v275_v12 = vadd.f32 %v177_v2, %v176_v58  ;;  %v182_v17 = vmul.f32 %v820_v13, %v54_v59  ;;  %v72_v57 = vld [vmem:[#allocation3 + $0x150] sm:$0xff]  ;;  %v73_v58 = vld [vmem:[#allocation3 + $0x158] sm:$0xff]  ;;  %v74_v59 = vld [vmem:[#allocation3 + $0x160] sm:$0xff] }
  0x23   :  { %v257_v11 = vadd.f32 %v256_v61, %v162_v36  ;;  %v183_v18 = vmul.f32 %v822_v14, %v55_v60  ;;  %v180_v24 = vmul.f32 %v828_v21, %v52_v63  ;;  %v184_v26 = vmul.f32 %v824_v15, %v56_v4  ;;  %v70_v63 = vld [vmem:[#allocation3 + $0x140] sm:$0xff]  ;;  %v71_v2 = vld [vmem:[#allocation3 + $0x148] sm:$0xff] }
  0x24   :  { %v271_v20 = vadd.f32 %v270_v5, %v174_v50  ;;  %v263_v23 = vadd.f32 %v262_v7, %v167_v56  ;;  %v181_v30 = vmul.f32 %v830_v22, %v53_v8  ;;  %v276_v31 = vadd.f32 %v275_v12, %v178_v3  ;;  %v75_v8 = vld [vmem:[#allocation3 + $0x168] sm:$0xff] }
  0x25   :  { %v258_v29 = vadd.f32 %v257_v11, %v163_v37  ;;  %v185_v33 = vmul.f32 %v826_v16, %v57_v10  ;;  %v282_v38 = vadd.f32 %v183_v18, %v182_v17  ;;  %v188_v39 = vmul.f32 %v820_v13, %v60_v19  ;;  %v65_v37 = vld [vmem:[#allocation3 + $0x118] sm:$0xff]  ;;  %v79_v18 = vld [vmem:[#allocation3 + $0x188] sm:$0xff]  ;;  %v80_v19 = vld [vmem:[#allocation3 + $0x190] sm:$0xff] }
  0x26   :  { %v272_v35 = vadd.f32 %v271_v20, %v175_v51  ;;  %v264_v36 = vadd.f32 %v263_v23, %v168_v62  ;;  %v277_v42 = vadd.f32 %v276_v31, %v179_v9  ;;  %v186_v43 = vmul.f32 %v828_v21, %v58_v25  ;;  %v78_v9 = vld [vmem:[#allocation3 + $0x180] sm:$0xff] }
  0x27   :  { %259 = vadd.xlane.f32.xlu0 %v258_v29  ;;  %v189_v45 = vmul.f32 %v822_v14, %v61_v27  ;;  %v190_v46 = vmul.f32 %v824_v15, %v62_v28  ;;  %v187_v49 = vmul.f32 %v830_v22, %v59_v32  ;;  %v283_v50 = vadd.f32 %v282_v38, %v184_v26  ;;  %v76_v26 = vld [vmem:[#allocation3 + $0x170] sm:$0xff]  ;;  %v77_v27 = vld [vmem:[#allocation3 + $0x178] sm:$0xff] }
  0x28   :  { %273 = vadd.xlane.f32.xlu1 %v272_v35  ;;  %v265_v48 = vadd.f32 %v264_v36, %v169_v6  ;;  %v191_v51 = vmul.f32 %v826_v16, %v63_v34  ;;  %v278_v53 = vadd.f32 %v277_v42, %v180_v24  ;;  %v194_v55 = vmul.f32 %v820_v13, %v66_v40  ;;  %v81_v28 = vld [vmem:[#allocation3 + $0x198] sm:$0xff]  ;;  %v82_v36 = vld [vmem:[#allocation3 + $0x1a0] sm:$0xff] }
  0x29   :  { %v289_v54 = vadd.f32 %v189_v45, %v188_v39  ;;  %v195_v56 = vmul.f32 %v822_v14, %v67_v41  ;;  %v284_v60 = vadd.f32 %v283_v50, %v185_v33  ;;  %v192_v61 = vmul.f32 %v828_v21, %v64_v44  ;;  %v84_v33 = vld [vmem:[#allocation3 + $0x1b0] sm:$0xff]  ;;  %v85_v40 = vld [vmem:[#allocation3 + $0x1b8] sm:$0xff]  ;;  %v86_v41 = vld [vmem:[#allocation3 + $0x1c0] sm:$0xff] }
  0x2a   :  { %v193_v62 = vmul.f32 %v830_v22, %v65_v37  ;;  %v196_v3 = vmul.f32 %v824_v15, %v68_v47  ;;  %v279_v4 = vadd.f32 %v278_v53, %v181_v30  ;;  %v197_v6 = vmul.f32 %v826_v16, %v69_v52  ;;  %v83_v37 = vld [vmem:[#allocation3 + $0x1a8] sm:$0xff] }
  0x2b   :  { %266 = vadd.xlane.f32.xlu0 %v265_v48  ;;  %v290_v5 = vadd.f32 %v289_v54, %v190_v46  ;;  %v296_v7 = vadd.f32 %v195_v56, %v194_v55  ;;  %v285_v10 = vadd.f32 %v284_v60, %v186_v43  ;;  %v200_v11 = vmul.f32 %v820_v13, %v72_v57  ;;  %v87_v46 = vld [vmem:[#allocation3 + $0x1c8] sm:$0xff]  ;;  %v88_v55 = vld [vmem:[#allocation3 + $0x1d0] sm:$0xff]  ;;  %v89_v56 = vld [vmem:[#allocation3 + $0x1d8] sm:$0xff] }
  0x2c   :  { %v201_v12 = vmul.f32 %v822_v14, %v73_v58  ;;  %v202_v17 = vmul.f32 %v824_v15, %v74_v59  ;;  %280 = vadd.xlane.f32.xlu1 %v279_v4  ;;  %v198_v23 = vmul.f32 %v828_v21, %v70_v63  ;;  %v199_v24 = vmul.f32 %v830_v22, %v71_v2  ;;  %v91_v52 = vld [vmem:[#allocation3 + $0x1e8] sm:$0xff]  ;;  %v92_v59 = vld [vmem:[#allocation3 + $0x1f0] sm:$0xff]  ;;  %v93_v2 = vld [vmem:[#allocation3 + $0x1f8] sm:$0xff] }
  0x2d   :  { %v291_v20 = vadd.f32 %v290_v5, %v191_v51  ;;  %v297_v25 = vadd.f32 %v296_v7, %v196_v3  ;;  %v286_v29 = vadd.f32 %v285_v10, %v187_v49  ;;  %v203_v30 = vmul.f32 %v826_v16, %v75_v8  ;;  %v90_v51 = vld [vmem:[#allocation3 + $0x1e0] sm:$0xff]  ;;  %v96_v7 = vld [vmem:[#allocation3 + $0x210] sm:$0xff]  ;;  %v97_v8 = vld [vmem:[#allocation3 + $0x218] sm:$0xff] }
  0x2e   :  { %v303_v31 = vadd.f32 %v201_v12, %v200_v11  ;;  %v206_v32 = vmul.f32 %v820_v13, %v78_v9  ;;  %v207_v38 = vmul.f32 %v822_v14, %v79_v18  ;;  %v208_v39 = vmul.f32 %v824_v15, %v80_v19  ;;  %v98_v9 = vld [vmem:[#allocation3 + $0x220] sm:$0xff]  ;;  %v95_v18 = vld [vmem:[#allocation3 + $0x208] sm:$0xff] }
  0x2f   :  { %v292_v34 = vadd.f32 %v291_v20, %v192_v61  ;;  %v298_v35 = vadd.f32 %v297_v25, %v197_v6  ;;  %287 = vadd.xlane.f32.xlu0 %v286_v29  ;;  %v204_v42 = vmul.f32 %v828_v21, %v76_v26  ;;  %v205_v43 = vmul.f32 %v830_v22, %v77_v27  ;;  %v99_v26 = vld [vmem:[#allocation3 + $0x228] sm:$0xff]  ;;  %v102_v27 = vld [vmem:[#allocation3 + $0x240] sm:$0xff] }
  0x30   :  { %v304_v44 = vadd.f32 %v303_v31, %v202_v17  ;;  %v209_v45 = vmul.f32 %v826_v16, %v81_v28  ;;  %v310_v49 = vadd.f32 %v207_v38, %v206_v32  ;;  %v212_v50 = vmul.f32 %v820_v13, %v84_v33  ;;  %v94_v17 = vld [vmem:[#allocation3 + $0x200] sm:$0xff]  ;;  %v103_v32 = vld [vmem:[#allocation3 + $0x248] sm:$0xff]  ;;  %v104_v33 = vld [vmem:[#allocation3 + $0x250] sm:$0xff] }
  0x31   :  { %v293_v47 = vadd.f32 %v292_v34, %v193_v62  ;;  %v299_v48 = vadd.f32 %v298_v35, %v198_v23  ;;  %v210_v54 = vmul.f32 %v828_v21, %v82_v36  ;;  %v213_v57 = vmul.f32 %v822_v14, %v85_v40  ;;  %v105_v40 = vld [vmem:[#allocation3 + $0x258] sm:$0xff] }
  0x32   :  { %v305_v53 = vadd.f32 %v304_v44, %v203_v30  ;;  %v214_v58 = vmul.f32 %v824_v15, %v86_v41  ;;  %v211_v61 = vmul.f32 %v830_v22, %v83_v37  ;;  %v311_v62 = vadd.f32 %v310_v49, %v208_v39  ;;  %v100_v39 = vld [vmem:[#allocation3 + $0x230] sm:$0xff] }
  0x33   :  { %294 = vadd.xlane.f32.xlu1 %v293_v47  ;;  %v300_v60 = vadd.f32 %v299_v48, %v199_v24  ;;  %v215_v63 = vmul.f32 %v826_v16, %v87_v46  ;;  %v317_v4 = vadd.f32 %v213_v57, %v212_v50  ;;  %v218_v5 = vmul.f32 %v820_v13, %v90_v51  ;;  %v108_v37 = vld [vmem:[#allocation3 + $0x270] sm:$0xff]  ;;  %v101_v47 = vld [vmem:[#allocation3 + $0x238] sm:$0xff]  ;;  %v110_v51 = vld [vmem:[#allocation3 + $0x280] sm:$0xff] }
  0x34   :  { %v306_v3 = vadd.f32 %v305_v53, %v204_v42  ;;  %v219_v6 = vmul.f32 %v822_v14, %v91_v52  ;;  %v312_v10 = vadd.f32 %v311_v62, %v209_v45  ;;  %v216_v11 = vmul.f32 %v828_v21, %v88_v55  ;;  %v109_v50 = vld [vmem:[#allocation3 + $0x278] sm:$0xff]  ;;  %v115_v62 = vld [vmem:[#allocation3 + $0x2a8] sm:$0xff] }
  0x35   :  { %301 = vadd.xlane.f32.xlu0 %v300_v60  ;;  %v217_v12 = vmul.f32 %v830_v22, %v89_v56  ;;  %v220_v19 = vmul.f32 %v824_v15, %v92_v59  ;;  %v318_v23 = vadd.f32 %v317_v4, %v214_v58  ;;  %v221_v24 = vmul.f32 %v826_v16, %v93_v2  ;;  %v111_v56 = vld [vmem:[#allocation3 + $0x288] sm:$0xff]  ;;  %v112_v4 = vld [vmem:[#allocation3 + $0x290] sm:$0xff] }
  0x36   :  { %v307_v20 = vadd.f32 %v306_v3, %v205_v43  ;;  %v324_v25 = vadd.f32 %v219_v6, %v218_v5  ;;  %v313_v28 = vadd.f32 %v312_v10, %v210_v54  ;;  %v224_v29 = vmul.f32 %v820_v13, %v96_v7  ;;  %v106_v54 = vld [vmem:[#allocation3 + $0x260] sm:$0xff]  ;;  %v107_v3 = vld [vmem:[#allocation3 + $0x268] sm:$0xff]  ;;  %v116_v7 = vld [vmem:[#allocation3 + $0x2b0] sm:$0xff] }
  0x37   :  { %v225_v30 = vmul.f32 %v822_v14, %v97_v8  ;;  %v226_v31 = vmul.f32 %v824_v15, %v98_v9  ;;  %v319_v34 = vadd.f32 %v318_v23, %v215_v63  ;;  %v222_v35 = vmul.f32 %v828_v21, %v94_v17  ;;  %v120_v23 = vld [vmem:[#allocation3 + $0x2d0] sm:$0xff] }
  0x38   :  { %308 = vadd.xlane.f32.xlu1 %v307_v20  ;;  %v223_v36 = vmul.f32 %v830_v22, %v95_v18  ;;  %v325_v38 = vadd.f32 %v324_v25, %v220_v19  ;;  %v314_v41 = vadd.f32 %v313_v28, %v211_v61  ;;  %v227_v42 = vmul.f32 %v826_v16, %v99_v26  ;;  %v114_v61 = vld [vmem:[#allocation3 + $0x2a0] sm:$0xff]  ;;  %v113_v28 = vld [vmem:[#allocation3 + $0x298] sm:$0xff] }
  0x39   :  { %v331_v43 = vadd.f32 %v225_v30, %v224_v29  ;;  %v230_v44 = vmul.f32 %v820_v13, %v102_v27  ;;  %v320_v45 = vadd.f32 %v319_v34, %v216_v11  ;;  %v231_v48 = vmul.f32 %v822_v14, %v103_v32  ;;  %v122_v25 = vld [vmem:[#allocation3 + $0x2e0] sm:$0xff] }
  0x3a   :  { %v326_v46 = vadd.f32 %v325_v38, %v221_v24  ;;  %v232_v49 = vmul.f32 %v824_v15, %v104_v33  ;;  %315 = vadd.xlane.f32.xlu0 %v314_v41  ;;  %v228_v52 = vmul.f32 %v828_v21, %v100_v39  ;;  %v233_v55 = vmul.f32 %v826_v16, %v105_v40  ;;  %v121_v24 = vld [vmem:[#allocation3 + $0x2d8] sm:$0xff]  ;;  %v118_v30 = vld [vmem:[#allocation3 + $0x2c0] sm:$0xff]  ;;  %v119_v39 = vld [vmem:[#allocation3 + $0x2c8] sm:$0xff] }
  0x3b   :  { %v332_v53 = vadd.f32 %v331_v43, %v226_v31  ;;  %v321_v57 = vadd.f32 %v320_v45, %v217_v12  ;;  %v338_v59 = vadd.f32 %v231_v48, %v230_v44  ;;  %v236_v60 = vmul.f32 %v820_v13, %v108_v37  ;;  %v117_v12 = vld [vmem:[#allocation3 + $0x2b8] sm:$0xff] }
  0x3c   :  { %v327_v58 = vadd.f32 %v326_v46, %v222_v35  ;;  %v229_v63 = vmul.f32 %v830_v22, %v101_v47  ;;  %v237_v5 = vmul.f32 %v822_v14, %v109_v50  ;;  %v238_v6 = vmul.f32 %v824_v15, %v110_v51  ;;  %v124_v46 = vld [vmem:[#allocation3 + $0x2f0] sm:$0xff] }
  0x3d   :  { %v333_v2 = vadd.f32 %v332_v53, %v227_v42  ;;  %322 = vadd.xlane.f32.xlu1 %v321_v57  ;;  %v234_v9 = vmul.f32 %v828_v21, %v106_v54  ;;  %v339_v10 = vadd.f32 %v338_v59, %v232_v49  ;;  %v239_v11 = vmul.f32 %v826_v16, %v111_v56 }
  0x3e   :  { %v328_v8 = vadd.f32 %v327_v58, %v223_v36  ;;  %v345_v18 = vadd.f32 %v237_v5, %v236_v60  ;;  %v242_v19 = vmul.f32 %v820_v13, %v114_v61  ;;  %v243_v20 = vmul.f32 %v822_v14, %v115_v62  ;;  %v123_v36 = vld [vmem:[#allocation3 + $0x2e8] sm:$0xff] }
  0x3f   :  { %v334_v17 = vadd.f32 %v333_v2, %v228_v52  ;;  %v235_v26 = vmul.f32 %v830_v22, %v107_v3  ;;  %v340_v27 = vadd.f32 %v339_v10, %v233_v55  ;;  %v240_v29 = vmul.f32 %v828_v21, %v112_v4  ;;  %v125_v52 = vld [vmem:[#allocation3 + $0x2f8] sm:$0xff] }
  0x40   :  { %329 = vadd.xlane.f32.xlu0 %v328_v8  ;;  %v244_v31 = vmul.f32 %v824_v15, %v116_v7  ;;  %v346_v33 = vadd.f32 %v345_v18, %v238_v6  ;;  %v245_v34 = vmul.f32 %v826_v16, %v117_v12  ;;  %v352_v35 = vadd.f32 %v243_v20, %v242_v19 }
  0x41   :  { %v335_v32 = vadd.f32 %v334_v17, %v229_v63  ;;  %v341_v38 = vadd.f32 %v340_v27, %v234_v9  ;;  %v248_v40 = vmul.f32 %v820_v13, %v120_v23  ;;  %v249_v41 = vmul.f32 %v822_v14, %v121_v24 }
  0x42   :  { %v250_v42 = vmul.f32 %v824_v15, %v122_v25  ;;  %v241_v43 = vmul.f32 %v830_v22, %v113_v28  ;;  %v347_v44 = vadd.f32 %v346_v33, %v239_v11  ;;  %v246_v37 = vmul.f32 %v828_v21, %v118_v30 }
  0x43   :  { %336 = vadd.xlane.f32.xlu1 %v335_v32  ;;  %v353_v45 = vadd.f32 %v352_v35, %v244_v31  ;;  %v342_v47 = vadd.f32 %v341_v38, %v235_v26  ;;  %v251_v48 = vmul.f32 %v826_v16, %v123_v36  ;;  %v359_v49 = vadd.f32 %v249_v41, %v248_v40 }
  0x44   :  { %v348_v50 = vadd.f32 %v347_v44, %v240_v29  ;;  %v247_v51 = vmul.f32 %v830_v22, %v119_v39  ;;  %v252_v14 = vmul.f32 %v828_v21, %v124_v46  ;;  %v253_v55 = vmul.f32 %v830_v22, %v125_v52 }
  0x45   :  { %v354_v13 = vadd.f32 %v353_v45, %v245_v34  ;;  %343 = vadd.xlane.f32.xlu0 %v342_v47  ;;  %v360_v15 = vadd.f32 %v359_v49, %v250_v42  ;;  %v931_v59 = vstv %s1001_s2  ;;  %vm607_vm12 = vcmask 917312   ;;  %s775_s2 = smov [#allocation6]  }
  0x46   :  { %v349_v53 = vadd.f32 %v348_v50, %v241_v43  ;;  %v944_v43 = vand.u32 127, %v128_v0  ;;  %vm614_vm13 = vcmask 982912   ;;  %s631_s28 = sshll.u32 %s775_s2, 4  ;;  %vm621_vm14 = vcmask 1048512   ;;  %s632_s28 = int_to_ptr.vmem [resolvable:$true] %s631_s28 }
  0x47   :  { %v355_v54 = vadd.f32 %v354_v13, %v246_v37  ;;  %v361_v56 = vadd.f32 %v360_v15, %v251_v48  ;;  %s746_s29 = scalar_lea.vmem %s632_s28, 16  ;;  %s750_s30 = scalar_lea.vmem %s632_s28, 32 }
  0x48   :  { %350 = vadd.xlane.f32.xlu1 %v349_v53  ;;  %v518_v46 = vadd.s32 4294967288, %v944_v43  ;;  %p747_p8 = scmp.ne.s32.totalorder %s632_s28, %s746_s29  ;;  %p751_p9 = scmp.lt.s32.totalorder %s632_s28, %s632_s28 }
  0x49   :  { %v356_v57 = vadd.f32 %v355_v54, %v247_v51  ;;  %v362_v58 = vadd.f32 %v361_v56, %v252_v14  ;;  %v525_v54 = vadd.s32 4294967280, %v944_v43  ;;  %p752_p10 = scmp.lt.s32.totalorder %s750_s30, %s746_s29 }
  0x4b   :  { %357 = vadd.xlane.f32.xlu0 %v356_v57  ;;  %v363_v16 = vadd.f32 %v362_v58, %v253_v55  ;;  %v521_v55 = vsub.s32 %v518_v46, %v809_v1  ;;  %v516_v58 = vsub.s32 %v944_v43, %v809_v1  ;;  %p753_p11 = por %p752_p10, %p751_p9 }
  0x4d   :  { %364 = vadd.xlane.f32.xlu1 %v363_v16  ;;  %p754_p12 = pnand %p753_p11, %p747_p8 }
  0xb4   :  { %v260_v60 = vpop.xlane.xlu0 %259 }
  0xb5   :  { %v368_v21 = vadd.f32 %v931_v59, %v260_v60  ;;  %v274_v61 = vpop.xlane.xlu1 %273  ;;  %v532_v60 = vadd.s32 4294967272, %v944_v43 }
  0xb6   :  { %v370_v62 = vadd.f32 %v931_v59, %v274_v61 }
  0xb7   :  { %v640_v63 = vmul.f32 -1.442695, %v368_v21 }
  0xb8   :  { %v642_v22 = vmul.f32 -1.442695, %v370_v62  ;;  %v267_v2 = vpop.xlane.xlu0 %266 }
  0xb9   :  { %660 = vpow2.f32 %v640_v63  ;;  %v369_v3 = vadd.f32 %v931_v59, %v267_v2  ;;  %v281_v4 = vpop.xlane.xlu1 %280 }
  0xba   :  { %662 = vpow2.f32 %v642_v22  ;;  %v371_v6 = vadd.f32 %v931_v59, %v281_v4 }
  0xbb   :  { %v641_v5 = vmul.f32 -1.442695, %v369_v3  ;;  %v539_v3 = vadd.s32 4294967264, %v944_v43 }
  0xbc   :  { %v643_v7 = vmul.f32 -1.442695, %v371_v6  ;;  %v288_v8 = vpop.xlane.xlu0 %287 }
  0xbd   :  { %664 = vpow2.f32 %v641_v5  ;;  %v372_v9 = vadd.f32 %v931_v59, %v288_v8  ;;  %v528_v5 = vsub.s32 %v525_v54, %v809_v1 }
  0xbe   :  { %666 = vpow2.f32 %v643_v7 }
  0xbf   :  { %v644_v10 = vmul.f32 -1.442695, %v372_v9 }
  0xc0   :  { %v295_v11 = vpop.xlane.xlu1 %294 }
  0xc1   :  { %v373_v12 = vadd.f32 %v931_v59, %v295_v11  ;;  %668 = vpow2.f32 %v644_v10  ;;  %v535_v11 = vsub.s32 %v532_v60, %v809_v1 }
  0xc2   :  { %v302_v17 = vpop.xlane.xlu0 %301 }
  0xc3   :  { %v661_v18 = vpop.eup %660  ;;  %v645_v19 = vmul.f32 -1.442695, %v373_v12  ;;  %v374_v20 = vadd.f32 %v931_v59, %v302_v17 }
  0xc4   :  { %v663_v23 = vpop.eup %662  ;;  %v432_v24 = vadd.f32 1.0, %v661_v18 }
  0xc5   :  { %v434_v25 = vadd.f32 1.0, %v663_v23  ;;  %670 = vpow2.f32 %v645_v19  ;;  %v646_v26 = vmul.f32 -1.442695, %v374_v20  ;;  %v309_v27 = vpop.xlane.xlu1 %308  ;;  %v542_v23 = vsub.s32 %v539_v3, %v809_v1 }
  0xc6   :  { %v375_v28 = vadd.f32 %v931_v59, %v309_v27  ;;  %672 = vrcp.f32 %v432_v24  ;;  %v546_v27 = vadd.s32 4294967256, %v944_v43 }
  0xc7   :  { %v665_v29 = vpop.eup %664  ;;  %674 = vpow2.f32 %v646_v26  ;;  %v316_v32 = vpop.xlane.xlu0 %315 }
  0xc8   :  { %v433_v30 = vadd.f32 1.0, %v665_v29  ;;  %v647_v31 = vmul.f32 -1.442695, %v375_v28  ;;  %v667_v33 = vpop.eup %666  ;;  %676 = vrcp.f32 %v434_v25  ;;  %v376_v34 = vadd.f32 %v931_v59, %v316_v32 }
  0xc9   :  { %v435_v35 = vadd.f32 1.0, %v667_v33  ;;  %v553_v33 = vadd.s32 4294967248, %v944_v43 }
  0xca   :  { %678 = vrcp.f32 %v433_v30  ;;  %v648_v36 = vmul.f32 -1.442695, %v376_v34  ;;  %v323_v38 = vpop.xlane.xlu1 %322 }
  0xcb   :  { %680 = vpow2.f32 %v647_v31  ;;  %v669_v39 = vpop.eup %668  ;;  %v377_v40 = vadd.f32 %v931_v59, %v323_v38 }
  0xcc   :  { %682 = vrcp.f32 %v435_v35  ;;  %v436_v41 = vadd.f32 1.0, %v669_v39 }
  0xcd   :  { %684 = vpow2.f32 %v648_v36  ;;  %v330_v42 = vpop.xlane.xlu0 %329  ;;  %v649_v44 = vmul.f32 -1.442695, %v377_v40 }
  0xce   :  { %v378_v37 = vadd.f32 %v931_v59, %v330_v42  ;;  %686 = vrcp.f32 %v436_v41  ;;  %v549_v42 = vsub.s32 %v546_v27, %v809_v1 }
  0xcf   :  { %v671_v45 = vpop.eup %670  ;;  %688 = vpow2.f32 %v649_v44  ;;  %v567_v44 = vadd.s32 4294967232, %v944_v43 }
  0xd0   :  { %v437_v47 = vadd.f32 1.0, %v671_v45  ;;  %v650_v48 = vmul.f32 -1.442695, %v378_v37  ;;  %v337_v49 = vpop.xlane.xlu1 %336  ;;  %v673_v50 = vpop.eup %672 }
  0xd1   :  { %v379_v51 = vadd.f32 %v931_v59, %v337_v49  ;;  %v675_v13 = vpop.eup %674  ;;  %v480_v61 = vmul.f32 2.0, %v673_v50  ;;  %v556_v49 = vsub.s32 %v553_v33, %v809_v1 }
  0xd2   :  { %v677_v52 = vpop.eup %676  ;;  %v438_v14 = vadd.f32 1.0, %v675_v13  ;;  %690 = vpow2.f32 %v650_v48  ;;  %v344_v15 = vpop.xlane.xlu0 %343 }
  0xd3   :  { %v651_v0 = vmul.f32 -1.442695, %v379_v51  ;;  %692 = vrcp.f32 %v437_v47  ;;  %v380_v56 = vadd.f32 %v931_v59, %v344_v15  ;;  %v482_v10 = vmul.f32 2.0, %v677_v52 }
  0xd4   :  { %v679_v53 = vpop.eup %678  ;;  %694 = vrcp.f32 %v438_v14  ;;  %v517_v18 = vrot.slane %v480_v61, %v516_v58  ;;  %v570_v14 = vsub.s32 %v567_v44, %v809_v1 }
  0xd5   :  { %v681_v57 = vpop.eup %680  ;;  %v481_v16 = vmul.f32 2.0, %v679_v53  ;;  %696 = vpow2.f32 %v651_v0  ;;  %v652_v63 = vmul.f32 -1.442695, %v380_v56  ;;  %v351_v22 = vpop.xlane.xlu1 %350  ;;  %v529_v31 = vrot.slane %v482_v10, %v528_v5 }
  0xd6   :  { %v683_v21 = vpop.eup %682  ;;  %v439_v62 = vadd.f32 1.0, %v681_v57  ;;  %v381_v4 = vadd.f32 %v931_v59, %v351_v22  ;;  %v574_v0 = vadd.s32 4294967224, %v944_v43  ;;  %v581_v57 = vadd.s32 4294967216, %v944_v43 }
  0xd7   :  { %v685_v2 = vpop.eup %684  ;;  %v522_v6 = vrot.slane %v481_v16, %v521_v55  ;;  %v483_v19 = vmul.f32 2.0, %v683_v21 }
  0xd8   :  { %698 = vrcp.f32 %v439_v62  ;;  %v440_v7 = vadd.f32 1.0, %v685_v2  ;;  %v358_v8 = vpop.xlane.xlu0 %357  ;;  %v687_v9 = vpop.eup %686  ;;  %v653_v12 = vmul.f32 -1.442695, %v381_v4  ;;  %v577_v62 = vsub.s32 %v574_v0, %v809_v1 }
  0xd9   :  { %700 = vpow2.f32 %v652_v63  ;;  %v689_v17 = vpop.eup %688  ;;  %v382_v20 = vadd.f32 %v931_v59, %v358_v8  ;;  %v524_v26 = vsel %vm523_vm0, %v522_v6, %v517_v18  ;;  %v484_v32 = vmul.f32 2.0, %v687_v9 }
  0xda   :  { %702 = vrcp.f32 %v440_v7  ;;  %v441_v24 = vadd.f32 1.0, %v689_v17  ;;  %v365_v25 = vpop.xlane.xlu1 %364  ;;  %v536_v35 = vrot.slane %v483_v19, %v535_v11  ;;  %v531_v40 = vsel %vm530_vm1, %v529_v31, %v524_v26 }
  0xdb   :  { %704 = vpow2.f32 %v653_v12  ;;  %v654_v28 = vmul.f32 -1.442695, %v382_v20  ;;  %v383_v29 = vadd.f32 %v931_v59, %v365_v25  ;;  %v560_v59 = vadd.s32 4294967240, %v944_v43 }
  0xdc   :  { %v691_v30 = vpop.eup %690  ;;  %706 = vrcp.f32 %v441_v24  ;;  %v543_v37 = vrot.slane %v484_v32, %v542_v23  ;;  %v538_v48 = vsel %vm537_vm2, %v536_v35, %v531_v40  ;;  %v588_v63 = vadd.s32 4294967208, %v944_v43 }
  0xdd   :  { %v693_v34 = vpop.eup %692  ;;  %v442_v36 = vadd.f32 1.0, %v691_v30  ;;  %708 = vpow2.f32 %v654_v28  ;;  %v655_v38 = vmul.f32 -1.442695, %v383_v29  ;;  %v563_v52 = vsub.s32 %v560_v59, %v809_v1 }
  0xde   :  { %v695_v39 = vpop.eup %694  ;;  %v485_v45 = vmul.f32 2.0, %v693_v34  ;;  %v545_v54 = vsel %vm544_vm3, %v543_v37, %v538_v48  ;;  %v584_v8 = vsub.s32 %v581_v57, %v809_v1  ;;  %v595_v11 = vadd.s32 4294967200, %v944_v43 }
  0xdf   :  { %v697_v41 = vpop.eup %696  ;;  %710 = vrcp.f32 %v442_v36  ;;  %v486_v50 = vmul.f32 2.0, %v695_v39  ;;  %v591_v20 = vsub.s32 %v588_v63, %v809_v1  ;;  %v602_v23 = vadd.s32 4294967192, %v944_v43 }
  0xe0   :  { %v443_v46 = vadd.f32 1.0, %v697_v41  ;;  %712 = vpow2.f32 %v655_v38  ;;  %v550_v55 = vrot.slane %v485_v45, %v549_v42  ;;  %v598_v27 = vsub.s32 %v595_v11, %v809_v1 }
  0xe1   :  { %v557_v58 = vrot.slane %v486_v50, %v556_v49  ;;  %v609_v29 = vadd.s32 4294967184, %v944_v43  ;;  %v605_v33 = vsub.s32 %v602_v23, %v809_v1  ;;  %v616_v39 = vadd.s32 4294967176, %v944_v43 }
  0xe2   :  { %v699_v47 = vpop.eup %698  ;;  %714 = vrcp.f32 %v443_v46  ;;  %v552_v22 = vsel %vm551_vm4, %v550_v55, %v545_v54 }
  0xe3   :  { %v701_v51 = vpop.eup %700  ;;  %v487_v56 = vmul.f32 2.0, %v699_v47  ;;  %v559_v6 = vsel %vm558_vm5, %v557_v58, %v552_v22  ;;  %v612_v40 = vsub.s32 %v609_v29, %v809_v1  ;;  %v619_v45 = vsub.s32 %v616_v39, %v809_v1 }
  0xe4   :  { %v703_v13 = vpop.eup %702  ;;  %v444_v15 = vadd.f32 1.0, %v701_v51 }
  0xe5   :  { %v705_v53 = vpop.eup %704  ;;  %v488_v16 = vmul.f32 2.0, %v703_v13  ;;  %v564_v2 = vrot.slane %v487_v56, %v563_v52 }
  0xe6   :  { %716 = vrcp.f32 %v444_v15  ;;  %v445_v60 = vadd.f32 1.0, %v705_v53  ;;  %v707_v21 = vpop.eup %706 }
  0xe7   :  { %v709_v61 = vpop.eup %708  ;;  %v489_v3 = vmul.f32 2.0, %v707_v21  ;;  %v571_v7 = vrot.slane %v488_v16, %v570_v14  ;;  %v566_v18 = vsel %vm565_vm6, %v564_v2, %v559_v6 }
  0xe8   :  { %718 = vrcp.f32 %v445_v60  ;;  %v446_v4 = vadd.f32 1.0, %v709_v61 }
  0xe9   :  { %v711_v5 = vpop.eup %710  ;;  %v578_v19 = vrot.slane %v489_v3, %v577_v62  ;;  %v573_v24 = vsel %vm572_vm7, %v571_v7, %v566_v18 }
  0xea   :  { %v713_v9 = vpop.eup %712  ;;  %v490_v10 = vmul.f32 2.0, %v711_v5  ;;  %720 = vrcp.f32 %v446_v4 }
  0xeb   :  { %v447_v12 = vadd.f32 1.0, %v713_v9  ;;  %v580_v30 = vsel %vm579_vm8, %v578_v19, %v573_v24 }
  0xec   :  { %v715_v17 = vpop.eup %714  ;;  %v585_v25 = vrot.slane %v490_v10, %v584_v8 }
  0xed   :  { %v491_v26 = vmul.f32 2.0, %v715_v17  ;;  %722 = vrcp.f32 %v447_v12 }
  0xee   :  { %v587_v35 = vsel %vm586_vm9, %v585_v25, %v580_v30 }
  0xef   :  { %v592_v31 = vrot.slane %v491_v26, %v591_v20 }
  0xf0   :  { %v717_v28 = vpop.eup %716 }
  0xf1   :  { %v492_v32 = vmul.f32 2.0, %v717_v28  ;;  %v594_v59 = vsel %vm593_vm10, %v592_v31, %v587_v35 }
  0xf2   :  { %v719_v34 = vpop.eup %718 }
  0xf3   :  { %v599_v36 = vrot.slane %v492_v32, %v598_v27  ;;  %v493_v38 = vmul.f32 2.0, %v719_v34 }
  0xf4   :  { %v721_v41 = vpop.eup %720 }
  0xf5   :  { %v606_v42 = vrot.slane %v493_v38, %v605_v33  ;;  %v494_v44 = vmul.f32 2.0, %v721_v41  ;;  %v601_v37 = vsel %vm600_vm11, %v599_v36, %v594_v59 }
  0xf7   :  { %v723_v46 = vpop.eup %722  ;;  %v613_v47 = vrot.slane %v494_v44, %v612_v40  ;;  %v608_v49 = vsel %vm607_vm12, %v606_v42, %v601_v37 }
  0xf8   :  { %v495_v48 = vmul.f32 2.0, %v723_v46 }
  0xf9   :  { %v615_v50 = vsel %vm614_vm13, %v613_v47, %v608_v49 }
  0xfa   :  { %v620_v43 = vrot.slane %v495_v48, %v619_v45 }
  0xfc   :  { %v622_v51 = vsel %vm621_vm14, %v620_v43, %v615_v50 }
  0xfd   :  { %624 = vst [vmem:[#allocation6] sm:$0x1] %v622_v51 }
  0xfe   :  { %757 = shalt.err (!%p754_p12)
}
  0xff   :  { %s758_s6 = scalar_lea.hbm %s1002_s3, 16 }
 0x100   :  { %p759_p13 = scmp.ne.s32.totalorder %s1002_s3, %s758_s6  ;;  %p762_p0 = scmp.lt.u32.totalorder %s758_s6, %s1002_s3 }
 0x102   :  { %p764_p1 = pnand %p762_p0, %p759_p13 }
 0x104   :  { %767 = shalt.err (!%p764_p1)
}
 0x105   :  { %634 = dma.vmem_to_hbm [thread:$0]  %s632_s28, 16, %s1002_s3, [#allocation5]  }
 0x106   :  { %770 = dma.done.wait [#allocation5], 16  }
 0x107   :  { %771 = vsyncadd [#allocation5], 4294967280 }
 0x108   :  { %638 = vsyncpa [#allocation4], 1 }
 0x109   :  { %639 = vsyncpa [#allocation5], 1 }

</bundles_post_ra>
